<compile_context>
chip_gen: v5e
topology: v5e:2x2
jax: 0.10.0
libtpu: 0.0.40
codegen_flags: <defaults>
</compile_context>

<pallas_src>
import jax
import jax.numpy as jnp
from jax.experimental import pallas as pl
from jax.experimental.pallas import tpu as pltpu

BN_EPS = 1e-5


# --------------------------------------------------------------------------------------
# Kernel: one (TB,) batch tile through the whole (BN-folded, gather-fused) MLP.
# --------------------------------------------------------------------------------------
def dnn_regressor_kernel(xc_ref, xn_ref, spread_ref, lane_v_ref, m_emb_ref, w1n_ref,
                         b1_ref, w2_ref, b2_ref, w3_ref, b3_ref, w4t_ref, o_ref):
    # ---- fused embedding gather + layer 1 ------------------------------------------------
    # x_cat values are tiny ints (< vocab), exact in bf16.  spread[c, c*V+v] = 1 replicates
    # each categorical column across its vocab block via the MXU, so
    #     xs[b, c*V + v] == x_cat[b, c]        (exact),
    # and equality against the constant lane row lane_v[0, c*V+v] = v gives the flattened
    # one-hot of the gather.  onehot @ M_emb then equals emb_flatten @ W1_emb.
    xc = xc_ref[...].astype(jnp.bfloat16)                                    # (TB, C)
    xs = jnp.dot(xc, spread_ref[...], preferred_element_type=jnp.float32)    # (TB, C*V)
    onehot = jnp.where(xs == lane_v_ref[...], 1.0, 0.0).astype(jnp.bfloat16)

    z = (jnp.dot(onehot, m_emb_ref[...], preferred_element_type=jnp.float32)
         + jnp.dot(xn_ref[...].astype(jnp.bfloat16), w1n_ref[...],
                   preferred_element_type=jnp.float32)
         + b1_ref[...])
    h = z + jnp.maximum(z, 0.0)            # residual ReLU; Dropout is identity in eval mode

    # ---- hidden layers 2, 3 (BN already folded into w/b) ---------------------------------
    for w_ref, b_ref in ((w2_ref, b2_ref), (w3_ref, b3_ref)):
        z = jnp.dot(h.astype(jnp.bfloat16), w_ref[...],
                    preferred_element_type=jnp.float32) + b_ref[...]
        h = z + jnp.maximum(z, 0.0)

    # ---- final Linear, lane-dense: (1, H) x (TB, H)^T -> (1, TB) --------------------------
    # (Any transpose Mosaic emits for the contraction goes through the XLU slot and hides
    #  under the MXU/VPU work for this tile.)
    out = jnp.einsum("oh,bh->ob", w4t_ref[...], h.astype(jnp.bfloat16),
                     preferred_element_type=jnp.float32)
    o_ref[...] = out


# --------------------------------------------------------------------------------------
# Wrapper: host-side weight prep (BN folding, embedding/layer-1 fusion) + pallas_call.
# --------------------------------------------------------------------------------------
def _round_up(x, m):
    return ((x + m - 1) // m) * m


def _fold_bn(w, b, gamma, beta, mean, var):
    scale = gamma * jax.lax.rsqrt(var + BN_EPS)          # (1, dout)
    return w * scale, (b - mean) * scale + beta


def dnn_regressor_forward(x_cat, x_num, params, tb=1024):
    """Eval-mode forward: running-stats BatchNorm (folded) and identity Dropout."""
    B, str_cols = x_cat.shape
    num_cols = x_num.shape[1]
    emb = params["emb"]                                  # (vocab, emb_dim), vocab = str_cols + 1
    vocab, emb_dim = emb.shape
    sv = str_cols * vocab

    # ---- fold BN into Linear 1..3 ---------------------------------------------------------
    ws, bs = [], []
    for i in (1, 2, 3):
        p = params[f"fc{i}"]
        w_f, b_f = _fold_bn(p["w"], p["b"], p["gamma"], p["beta"], p["mean"], p["var"])
        ws.append(w_f)
        bs.append(b_f.astype(jnp.float32))
    hid = ws[0].shape[1]

    # ---- fold the embedding table into layer 1 (gather -> one-hot matmul) -----------------
    #   concat(emb_flat, x_num) @ W1 = onehot(x_cat) @ M_emb + x_num @ W1_num
    w1_emb = ws[0][: str_cols * emb_dim].reshape(str_cols, emb_dim, hid)       # (C, E, H)
    m_emb = jnp.einsum("ve,ceh->cvh", emb, w1_emb).reshape(sv, hid).astype(jnp.bfloat16)
    w1_num = ws[0][str_cols * emb_dim:].astype(jnp.bfloat16)                   # (num_cols, H)
    w2 = ws[1].astype(jnp.bfloat16)
    w3 = ws[2].astype(jnp.bfloat16)

    # tiny VMEM-resident helpers for the in-kernel one-hot
    spread = jnp.repeat(jnp.eye(str_cols, dtype=jnp.bfloat16), vocab, axis=1)  # (C, C*V)
    lane_v = jnp.tile(jnp.arange(vocab, dtype=jnp.float32), str_cols).reshape(1, sv)

    # final Linear weight as (1, H) for a lane-dense (1, TB) output row
    w4t = params["fc4"]["w"][:, 0].reshape(1, hid).astype(jnp.bfloat16)

    # ---- batch tiling: tb a multiple of 128; keep >= 2 grid steps when the batch allows ---
    tb = max(128, (int(tb) // 128) * 128)
    tb = min(tb, _round_up(B, 128))
    if tb > 128 and _round_up(B, tb) // tb < 2:
        tb = _round_up(tb // 2, 128)     # 2+ grid steps -> both v7x TensorCores stay busy
    b_pad = _round_up(B, tb)
    grid = (b_pad // tb,)

    xc_p = jnp.pad(x_cat.astype(jnp.int32), ((0, b_pad - B), (0, 0)))
    xn_p = jnp.pad(x_num.astype(jnp.float32), ((0, b_pad - B), (0, 0)))

    const = lambda i: (0, 0)             # weights / helpers: VMEM-resident across the grid
    out_row = pl.pallas_call(
        dnn_regressor_kernel,
        out_shape=jax.ShapeDtypeStruct((1, b_pad), jnp.float32),
        grid=grid,
        in_specs=[
            pl.BlockSpec((tb, str_cols), lambda i: (i, 0)),     # x_cat stream (int32)
            pl.BlockSpec((tb, num_cols), lambda i: (i, 0)),     # x_num stream (f32)
            pl.BlockSpec(spread.shape, const),
            pl.BlockSpec(lane_v.shape, const),
            pl.BlockSpec(m_emb.shape, const),
            pl.BlockSpec(w1_num.shape, const),
            pl.BlockSpec(bs[0].shape, const),
            pl.BlockSpec(w2.shape, const),
            pl.BlockSpec(bs[1].shape, const),
            pl.BlockSpec(w3.shape, const),
            pl.BlockSpec(bs[2].shape, const),
            pl.BlockSpec(w4t.shape, const),
        ],
        out_specs=pl.BlockSpec((1, tb), lambda i: (0, i)),
        compiler_params=pltpu.CompilerParams(dimension_semantics=("parallel",)),
    )(xc_p, xn_p, spread, lane_v, m_emb, w1_num, bs[0], w2, bs[1], w3, bs[2], w4t)

    # row 0 holds the real output column; the scalar fc4 bias is added here (kept off VMEM)
    return out_row[0, :B].reshape(B, 1) + params["fc4"]["b"]


# --------------------------------------------------------------------------------------
# Parameters / reference
# --------------------------------------------------------------------------------------
def init_params(key, str_cols, num_cols, emb_dim=2, hidden=128, out_dim=1):
    """Deterministic synthetic parameters matching the torch module's shapes."""
    ks = jax.random.split(key, 8)
    in_dim = str_cols * emb_dim + num_cols
    dims = [in_dim, hidden, hidden, hidden, out_dim]
    params = {"emb": jax.random.normal(ks[0], (str_cols + 1, emb_dim), jnp.float32)}
    for i in range(4):
        din, dout = dims[i], dims[i + 1]
        kw, kb, kg, kbe, km, kv = jax.random.split(ks[i + 1], 6)
        layer = {
            "w": jax.random.normal(kw, (din, dout), jnp.float32) / jnp.sqrt(jnp.float32(din)),
            "b": 0.1 * jax.random.normal(kb, (1, dout), jnp.float32),
        }
        if i < 3:  # last Linear has its BN/ReLU stripped ([:-2]) in the torch module
            layer.update({
                "gamma": 1.0 + 0.1 * jax.random.normal(kg, (1, dout), jnp.float32),
                "beta": 0.1 * jax.random.normal(kbe, (1, dout), jnp.float32),
                "mean": 0.1 * jax.random.normal(km, (1, dout), jnp.float32),
                "var": 1.0 + 0.1 * jax.random.uniform(kv, (1, dout), jnp.float32),
            })
        params[f"fc{i + 1}"] = layer
    return params


def reference_forward(x_cat, x_num, params):
    """Pure-JAX f32 reference (original, un-folded eval-mode semantics)."""
    emb = params["emb"][x_cat]
    h = jnp.concatenate([emb.reshape(emb.shape[0], -1), x_num], axis=-1)
    for i in (1, 2, 3):
        p = params[f"fc{i}"]
        z = h @ p["w"] + p["b"]
        z = (z - p["mean"]) / jnp.sqrt(p["var"] + BN_EPS) * p["gamma"] + p["beta"]
        h = z + jnp.maximum(z, 0.0)
    return h @ params["fc4"]["w"] + params["fc4"]["b"]


if __name__ == "__main__":
    # small, module-consistent shapes
    batch, str_cols, num_cols, emb_dim = 8, 4, 8, 2

    key = jax.random.PRNGKey(0)
    k_par, k_cat, k_num = jax.random.split(key, 3)

    params = init_params(k_par, str_cols, num_cols, emb_dim=emb_dim)
    x_cat = jax.random.randint(k_cat, (batch, str_cols), 0, str_cols + 1, dtype=jnp.int32)
    x_num = jax.random.normal(k_num, (batch, num_cols), jnp.float32)

    out = jax.block_until_ready(dnn_regressor_forward(x_cat, x_num, params))
    ref = jax.block_until_ready(reference_forward(x_cat, x_num, params))

    assert out.shape == (batch, 1), out.shape
    # bf16 MXU inputs + host-side BN/embedding folding: compare against the pure-f32 reference
    # with a tolerance scaled to the output magnitude.
    max_err = float(jnp.max(jnp.abs(out - ref)))
    tol = 5e-2 * (float(jnp.max(jnp.abs(ref))) + 1.0)
    assert max_err <= tol, (max_err, tol)

    print("KERNEL_OK")
</pallas_src>

<mosaic_0001>
module attributes {stable_mosaic.version = 11 : i64} {
  func.func @dnn_regressor_kernel(%arg0: i32, %arg1: memref<128x4xi32, #tpu.memory_space<vmem>>, %arg2: memref<128x8xf32, #tpu.memory_space<vmem>>, %arg3: memref<4x20xbf16, #tpu.memory_space<vmem>>, %arg4: memref<1x20xf32, #tpu.memory_space<vmem>>, %arg5: memref<20x128xbf16, #tpu.memory_space<vmem>>, %arg6: memref<8x128xbf16, #tpu.memory_space<vmem>>, %arg7: memref<1x128xf32, #tpu.memory_space<vmem>>, %arg8: memref<128x128xbf16, #tpu.memory_space<vmem>>, %arg9: memref<1x128xf32, #tpu.memory_space<vmem>>, %arg10: memref<128x128xbf16, #tpu.memory_space<vmem>>, %arg11: memref<1x128xf32, #tpu.memory_space<vmem>>, %arg12: memref<1x128xbf16, #tpu.memory_space<vmem>>, %arg13: memref<1x128xf32, #tpu.memory_space<vmem>>) attributes {dimension_semantics = [#tpu.dimension_semantics<parallel>], iteration_bounds = array<i64: 1>, scalar_prefetch = 0 : i64, scratch_operands = 0 : i64, tpu.core_type = #tpu.core_type<tc>, window_params = [{transform_indices = @transform_0, window_bounds = array<i64: 128, 4>}, {transform_indices = @transform_1, window_bounds = array<i64: 128, 8>}, {pipeline_mode = #tpu.pipeline_mode<synchronous>, transform_indices = @transform_2, window_bounds = array<i64: 4, 20>}, {pipeline_mode = #tpu.pipeline_mode<synchronous>, transform_indices = @transform_3, window_bounds = array<i64: 1, 20>}, {pipeline_mode = #tpu.pipeline_mode<synchronous>, transform_indices = @transform_4, window_bounds = array<i64: 20, 128>}, {pipeline_mode = #tpu.pipeline_mode<synchronous>, transform_indices = @transform_5, window_bounds = array<i64: 8, 128>}, {pipeline_mode = #tpu.pipeline_mode<synchronous>, transform_indices = @transform_6, window_bounds = array<i64: 1, 128>}, {pipeline_mode = #tpu.pipeline_mode<synchronous>, transform_indices = @transform_7, window_bounds = array<i64: 128, 128>}, {pipeline_mode = #tpu.pipeline_mode<synchronous>, transform_indices = @transform_8, window_bounds = array<i64: 1, 128>}, {pipeline_mode = #tpu.pipeline_mode<synchronous>, transform_indices = @transform_9, window_bounds = array<i64: 128, 128>}, {pipeline_mode = #tpu.pipeline_mode<synchronous>, transform_indices = @transform_10, window_bounds = array<i64: 1, 128>}, {pipeline_mode = #tpu.pipeline_mode<synchronous>, transform_indices = @transform_11, window_bounds = array<i64: 1, 128>}, {transform_indices = @transform_12, window_bounds = array<i64: 1, 128>}]} {
    %c0 = arith.constant 0 : index
    %c0_0 = arith.constant 0 : index
    %0 = vector.load %arg1[%c0, %c0_0] : memref<128x4xi32, #tpu.memory_space<vmem>>, vector<128x4xi32>
    %1 = arith.sitofp %0 : vector<128x4xi32> to vector<128x4xbf16>
    %c0_1 = arith.constant 0 : index
    %c0_2 = arith.constant 0 : index
    %2 = vector.load %arg3[%c0_1, %c0_2] : memref<4x20xbf16, #tpu.memory_space<vmem>>, vector<4x20xbf16>
    %cst = arith.constant dense<0.000000e+00> : vector<128x20xf32>
    %3 = tpu.matmul %1, %2, %cst {dimension_numbers = #tpu.dot_dimension_numbers<[1], [0], [0], [1], [0, 0, 1, 1], [], []>} : vector<128x4xbf16>, vector<4x20xbf16>, vector<128x20xf32> -> vector<128x20xf32>
    %c0_3 = arith.constant 0 : index
    %c0_4 = arith.constant 0 : index
    %4 = vector.load %arg4[%c0_3, %c0_4] : memref<1x20xf32, #tpu.memory_space<vmem>>, vector<1x20xf32>
    %5 = vector.broadcast %4 : vector<1x20xf32> to vector<128x20xf32>
    %6 = arith.cmpf oeq, %3, %5 : vector<128x20xf32>
    %cst_5 = arith.constant 1.000000e+00 : f32
    %cst_6 = arith.constant 0.000000e+00 : f32
    %7 = vector.broadcast %cst_5 : f32 to vector<128x20xf32>
    %8 = vector.broadcast %cst_6 : f32 to vector<128x20xf32>
    %9 = arith.select %6, %7, %8 : vector<128x20xi1>, vector<128x20xf32>
    %10 = arith.truncf %9 : vector<128x20xf32> to vector<128x20xbf16>
    %c0_7 = arith.constant 0 : index
    %c0_8 = arith.constant 0 : index
    %11 = vector.load %arg5[%c0_7, %c0_8] : memref<20x128xbf16, #tpu.memory_space<vmem>>, vector<20x128xbf16>
    %cst_9 = arith.constant dense<0.000000e+00> : vector<128x128xf32>
    %12 = tpu.matmul %10, %11, %cst_9 {dimension_numbers = #tpu.dot_dimension_numbers<[1], [0], [0], [1], [0, 0, 1, 1], [], []>} : vector<128x20xbf16>, vector<20x128xbf16>, vector<128x128xf32> -> vector<128x128xf32>
    %c0_10 = arith.constant 0 : index
    %c0_11 = arith.constant 0 : index
    %13 = vector.load %arg2[%c0_10, %c0_11] : memref<128x8xf32, #tpu.memory_space<vmem>>, vector<128x8xf32>
    %14 = arith.truncf %13 : vector<128x8xf32> to vector<128x8xbf16>
    %c0_12 = arith.constant 0 : index
    %c0_13 = arith.constant 0 : index
    %15 = vector.load %arg6[%c0_12, %c0_13] : memref<8x128xbf16, #tpu.memory_space<vmem>>, vector<8x128xbf16>
    %cst_14 = arith.constant dense<0.000000e+00> : vector<128x128xf32>
    %16 = tpu.matmul %14, %15, %cst_14 {dimension_numbers = #tpu.dot_dimension_numbers<[1], [0], [0], [1], [0, 0, 1, 1], [], []>} : vector<128x8xbf16>, vector<8x128xbf16>, vector<128x128xf32> -> vector<128x128xf32>
    %17 = arith.addf %12, %16 : vector<128x128xf32>
    %c0_15 = arith.constant 0 : index
    %c0_16 = arith.constant 0 : index
    %18 = vector.load %arg7[%c0_15, %c0_16] : memref<1x128xf32, #tpu.memory_space<vmem>>, vector<1x128xf32>
    %19 = vector.broadcast %18 : vector<1x128xf32> to vector<128x128xf32>
    %20 = arith.addf %17, %19 : vector<128x128xf32>
    %cst_17 = arith.constant 0.000000e+00 : f32
    %21 = vector.broadcast %cst_17 : f32 to vector<128x128xf32>
    %22 = arith.maximumf %20, %21 : vector<128x128xf32>
    %23 = arith.addf %20, %22 : vector<128x128xf32>
    %24 = arith.truncf %23 : vector<128x128xf32> to vector<128x128xbf16>
    %c0_18 = arith.constant 0 : index
    %c0_19 = arith.constant 0 : index
    %25 = vector.load %arg8[%c0_18, %c0_19] : memref<128x128xbf16, #tpu.memory_space<vmem>>, vector<128x128xbf16>
    %cst_20 = arith.constant dense<0.000000e+00> : vector<128x128xf32>
    %26 = tpu.matmul %24, %25, %cst_20 {dimension_numbers = #tpu.dot_dimension_numbers<[1], [0], [0], [1], [0, 0, 1, 1], [], []>} : vector<128x128xbf16>, vector<128x128xbf16>, vector<128x128xf32> -> vector<128x128xf32>
    %c0_21 = arith.constant 0 : index
    %c0_22 = arith.constant 0 : index
    %27 = vector.load %arg9[%c0_21, %c0_22] : memref<1x128xf32, #tpu.memory_space<vmem>>, vector<1x128xf32>
    %28 = vector.broadcast %27 : vector<1x128xf32> to vector<128x128xf32>
    %29 = arith.addf %26, %28 : vector<128x128xf32>
    %cst_23 = arith.constant 0.000000e+00 : f32
    %30 = vector.broadcast %cst_23 : f32 to vector<128x128xf32>
    %31 = arith.maximumf %29, %30 : vector<128x128xf32>
    %32 = arith.addf %29, %31 : vector<128x128xf32>
    %33 = arith.truncf %32 : vector<128x128xf32> to vector<128x128xbf16>
    %c0_24 = arith.constant 0 : index
    %c0_25 = arith.constant 0 : index
    %34 = vector.load %arg10[%c0_24, %c0_25] : memref<128x128xbf16, #tpu.memory_space<vmem>>, vector<128x128xbf16>
    %cst_26 = arith.constant dense<0.000000e+00> : vector<128x128xf32>
    %35 = tpu.matmul %33, %34, %cst_26 {dimension_numbers = #tpu.dot_dimension_numbers<[1], [0], [0], [1], [0, 0, 1, 1], [], []>} : vector<128x128xbf16>, vector<128x128xbf16>, vector<128x128xf32> -> vector<128x128xf32>
    %c0_27 = arith.constant 0 : index
    %c0_28 = arith.constant 0 : index
    %36 = vector.load %arg11[%c0_27, %c0_28] : memref<1x128xf32, #tpu.memory_space<vmem>>, vector<1x128xf32>
    %37 = vector.broadcast %36 : vector<1x128xf32> to vector<128x128xf32>
    %38 = arith.addf %35, %37 : vector<128x128xf32>
    %cst_29 = arith.constant 0.000000e+00 : f32
    %39 = vector.broadcast %cst_29 : f32 to vector<128x128xf32>
    %40 = arith.maximumf %38, %39 : vector<128x128xf32>
    %41 = arith.addf %38, %40 : vector<128x128xf32>
    %c0_30 = arith.constant 0 : index
    %c0_31 = arith.constant 0 : index
    %42 = vector.load %arg12[%c0_30, %c0_31] : memref<1x128xbf16, #tpu.memory_space<vmem>>, vector<1x128xbf16>
    %43 = arith.truncf %41 : vector<128x128xf32> to vector<128x128xbf16>
    "tpu.trace_start"() <{level = 10 : i32, message = "oh,bh->ob"}> : () -> ()
    %cst_32 = arith.constant dense<0.000000e+00> : vector<1x128xf32>
    %44 = tpu.matmul %42, %43, %cst_32 {dimension_numbers = #tpu.dot_dimension_numbers<[1], [1], [0], [0], [0, 0, 1, 0], [], []>} : vector<1x128xbf16>, vector<128x128xbf16>, vector<1x128xf32> -> vector<1x128xf32>
    "tpu.trace_stop"() : () -> ()
    %c0_33 = arith.constant 0 : index
    %c0_34 = arith.constant 0 : index
    %45 = vector.load %arg13[%c0_33, %c0_34] : memref<1x128xf32, #tpu.memory_space<vmem>>, vector<1x128xf32>
    tpu.vector_store %arg13[%c0_33, %c0_34], %44 {strides = array<i32>} : memref<1x128xf32, #tpu.memory_space<vmem>>, vector<1x128xf32>,
    return
  }
  func.func @transform_0(%arg0: i32) -> (i32, i32) {
    %c0_i32 = arith.constant 0 : i32
    %c0_i32_0 = arith.constant 0 : i32
    return %arg0, %c0_i32 : i32, i32
  }
  func.func @transform_1(%arg0: i32) -> (i32, i32) {
    %c0_i32 = arith.constant 0 : i32
    %c0_i32_0 = arith.constant 0 : i32
    return %arg0, %c0_i32 : i32, i32
  }
  func.func @transform_2(%arg0: i32) -> (i32, i32) {
    %c0_i32 = arith.constant 0 : i32
    %c0_i32_0 = arith.constant 0 : i32
    %c0_i32_1 = arith.constant 0 : i32
    return %c0_i32, %c0_i32_0 : i32, i32
  }
  func.func @transform_3(%arg0: i32) -> (i32, i32) {
    %c0_i32 = arith.constant 0 : i32
    %c0_i32_0 = arith.constant 0 : i32
    %c0_i32_1 = arith.constant 0 : i32
    return %c0_i32, %c0_i32_0 : i32, i32
  }
  func.func @transform_4(%arg0: i32) -> (i32, i32) {
    %c0_i32 = arith.constant 0 : i32
    %c0_i32_0 = arith.constant 0 : i32
    %c0_i32_1 = arith.constant 0 : i32
    return %c0_i32, %c0_i32_0 : i32, i32
  }
  func.func @transform_5(%arg0: i32) -> (i32, i32) {
    %c0_i32 = arith.constant 0 : i32
    %c0_i32_0 = arith.constant 0 : i32
    %c0_i32_1 = arith.constant 0 : i32
    return %c0_i32, %c0_i32_0 : i32, i32
  }
  func.func @transform_6(%arg0: i32) -> (i32, i32) {
    %c0_i32 = arith.constant 0 : i32
    %c0_i32_0 = arith.constant 0 : i32
    %c0_i32_1 = arith.constant 0 : i32
    return %c0_i32, %c0_i32_0 : i32, i32
  }
  func.func @transform_7(%arg0: i32) -> (i32, i32) {
    %c0_i32 = arith.constant 0 : i32
    %c0_i32_0 = arith.constant 0 : i32
    %c0_i32_1 = arith.constant 0 : i32
    return %c0_i32, %c0_i32_0 : i32, i32
  }
  func.func @transform_8(%arg0: i32) -> (i32, i32) {
    %c0_i32 = arith.constant 0 : i32
    %c0_i32_0 = arith.constant 0 : i32
    %c0_i32_1 = arith.constant 0 : i32
    return %c0_i32, %c0_i32_0 : i32, i32
  }
  func.func @transform_9(%arg0: i32) -> (i32, i32) {
    %c0_i32 = arith.constant 0 : i32
    %c0_i32_0 = arith.constant 0 : i32
    %c0_i32_1 = arith.constant 0 : i32
    return %c0_i32, %c0_i32_0 : i32, i32
  }
  func.func @transform_10(%arg0: i32) -> (i32, i32) {
    %c0_i32 = arith.constant 0 : i32
    %c0_i32_0 = arith.constant 0 : i32
    %c0_i32_1 = arith.constant 0 : i32
    return %c0_i32, %c0_i32_0 : i32, i32
  }
  func.func @transform_11(%arg0: i32) -> (i32, i32) {
    %c0_i32 = arith.constant 0 : i32
    %c0_i32_0 = arith.constant 0 : i32
    %c0_i32_1 = arith.constant 0 : i32
    return %c0_i32, %c0_i32_0 : i32, i32
  }
  func.func @transform_12(%arg0: i32) -> (i32, i32) {
    %c0_i32 = arith.constant 0 : i32
    %c0_i32_0 = arith.constant 0 : i32
    return %c0_i32, %arg0 : i32, i32
  }
}

</mosaic_0001>

<bundles_post_ra>
// kernel: tpu_custom_call.1
= control target key start
LH: loop header
LB: loop body
LE: loop exit
PB: predicated region body
PF: predicated region fallthrough
CT: control target
= control target key end

     0   :  { %vm109_vm0 = vcmask 1041408   ;;  %vm84_vm1 = vcmask 31744   ;;  %s1314_s0 = inlined_call_operand.vmem [shape: s32[128,4], index: 0, kind: input, shape index: {}]   ;;  %s1315_s1 = inlined_call_operand.vmem [shape: f32[128,8], index: 1, kind: input, shape index: {}]   ;;  %s1316_s2 = inlined_call_operand.vmem [shape: bf16[4,20], index: 2, kind: input, shape index: {}]   ;;  %s1317_s3 = inlined_call_operand.vmem [shape: f32[1,20], index: 3, kind: input, shape index: {}]   ;;  %s1318_s4 = inlined_call_operand.vmem [shape: bf16[20,128], index: 4, kind: input, shape index: {}]   ;;  %s1319_s5 = inlined_call_operand.vmem [shape: bf16[8,128], index: 5, kind: input, shape index: {}]   ;;  %s1320_s6 = inlined_call_operand.vmem [shape: f32[1,128], index: 6, kind: input, shape index: {}]   ;;  %s1321_s7 = inlined_call_operand.vmem [shape: bf16[128,128], index: 7, kind: input, shape index: {}]   ;;  %s1322_s8 = inlined_call_operand.vmem [shape: f32[1,128], index: 8, kind: input, shape index: {}]   ;;  %s1323_s9 = inlined_call_operand.vmem [shape: bf16[128,128], index: 9, kind: input, shape index: {}]   ;;  %s1324_s10 = inlined_call_operand.vmem [shape: f32[1,128], index: 10, kind: input, shape index: {}]   ;;  %s1325_s11 = inlined_call_operand.vmem [shape: bf16[1,128], index: 11, kind: input, shape index: {}]   ;;  %s1326_s12 = inlined_call_operand.hbm [shape: f32[1,128], index: 12, kind: output, shape index: {}]  }
   0x1   :  { %v83_v0 = vld [vmem:[%s1316_s2] sm:$0x3]  ;;  %v44_v2 = vld [vmem:[%s1314_s0 + $0x8] sm:$0xff] }
   0x2   :  { %v43_v1 = vld [vmem:[%s1314_s0] sm:$0xff]  ;;  %v111_v3 = vsel %vm109_vm0, %v83_v0, 0  ;;  %v60_v5 = vcvt.s32.f32 %v44_v2  ;;  %v48_v7 = vld [vmem:[%s1314_s0 + $0x28] sm:$0xff] }
   0x3   :  { %v59_v4 = vcvt.s32.f32 %v43_v1  ;;  %v47_v6 = vld [vmem:[%s1314_s0 + $0x20] sm:$0xff]  ;;  %120 = vmatpush.bf16.msra.mxu0 %v111_v3  ;;  %912 = vmatpush.bf16.msra.mxu1 %v111_v3  ;;  %v64_v10 = vcvt.s32.f32 %v48_v7  ;;  %v52_v12 = vld [vmem:[%s1314_s0 + $0x48] sm:$0xff] }
   0x4   :  { %v63_v8 = vcvt.s32.f32 %v47_v6  ;;  %913 = vmatpush.bf16.msra.mxu2 %v111_v3  ;;  %v51_v11 = vld [vmem:[%s1314_s0 + $0x40] sm:$0xff]  ;;  %914 = vmatpush.bf16.msra.mxu3 %v111_v3  ;;  %v68_v14 = vcvt.s32.f32 %v52_v12 }
   0x5   :  { %v75_v9 = vpack.c.bf16 %v60_v5, %v59_v4  ;;  %v67_v13 = vcvt.s32.f32 %v51_v11 }
   0x6   :  { %v77_v15 = vpack.c.bf16 %v64_v10, %v63_v8 }
   0x7   :  { %803 = vmatmul.msk.bf16.vlgmr.msra.gmra.mxu0 %vm84_vm1, %v75_v9  ;;  %v79_v16 = vpack.c.bf16 %v68_v14, %v67_v13 }
   0x8   :  { %17 = vsyncpa [#allocation3], 0  ;;  %805 = vmatmul.msk.bf16.vlgmr.msra.gmra.mxu1 %vm84_vm1, %v77_v15  ;;  %v57_v17 = vld [vmem:[%s1314_s0 + $0x70] sm:$0xff]  ;;  %v58_v18 = vld [vmem:[%s1314_s0 + $0x78] sm:$0xff]  ;;  %vm259_vm2 = vcmask 1043456   ;;  %vm234_vm3 = vcmask 64512  }
   0x9   :  { %807 = vmatmul.msk.bf16.vlgmr.msra.gmra.mxu2 %vm84_vm1, %v79_v16  ;;  %v73_v19 = vcvt.s32.f32 %v57_v17  ;;  %v74_v20 = vcvt.s32.f32 %v58_v18  ;;  %v45_v21 = vld [vmem:[%s1314_s0 + $0x10] sm:$0xff]  ;;  %v46_v22 = vld [vmem:[%s1314_s0 + $0x18] sm:$0xff]  ;;  %v55_v37 = vld [vmem:[%s1314_s0 + $0x60] sm:$0xff]  ;;  %v947_v61 = vmov 0.0   ;;  %vm321_vm6 = vcmask 162816   ;;  %s794_s24 = sshll.u32 %s1326_s12, 4  ;;  %s795_s24 = int_to_ptr.hbm [resolvable:$true] %s794_s24 }
   0xa   :  { %v49_v24 = vld [vmem:[%s1314_s0 + $0x30] sm:$0xff]  ;;  %v50_v25 = vld [vmem:[%s1314_s0 + $0x38] sm:$0xff]  ;;  %v61_v26 = vcvt.s32.f32 %v45_v21  ;;  %v62_v27 = vcvt.s32.f32 %v46_v22  ;;  %v56_v38 = vld [vmem:[%s1314_s0 + $0x68] sm:$0xff]  ;;  %v71_v39 = vcvt.s32.f32 %v55_v37 }
   0xb   :  { %v82_v23 = vpack.c.bf16 %v74_v20, %v73_v19  ;;  %v53_v28 = vld [vmem:[%s1314_s0 + $0x50] sm:$0xff]  ;;  %v54_v29 = vld [vmem:[%s1314_s0 + $0x58] sm:$0xff]  ;;  %v65_v30 = vcvt.s32.f32 %v49_v24  ;;  %v66_v31 = vcvt.s32.f32 %v50_v25  ;;  %v72_v40 = vcvt.s32.f32 %v56_v38  ;;  %v208_v42 = vld [vmem:[%s1318_s4 + $0x8] sm:$0x3]  ;;  %s948_s0 = smov [#allocation2]  }
   0xc   :  { %v69_v32 = vcvt.s32.f32 %v53_v28  ;;  %v70_v33 = vcvt.s32.f32 %v54_v29  ;;  %v76_v34 = vpack.c.bf16 %v62_v27, %v61_v26  ;;  %v317_v43 = vunpack.c.l.b16 %v208_v42  ;;  %v233_v46 = vld [vmem:[%s1319_s5] sm:$0xf]  ;;  %v210_v50 = vld [vmem:[%s1315_s1 + $0x8] sm:$0xff]  ;;  %v211_v52 = vld [vmem:[%s1315_s1 + $0x10] sm:$0xff]  ;;  %s792_s21 = sshll.u32 %s948_s0, 4  ;;  %s793_s21 = int_to_ptr.vmem [resolvable:$true] %s792_s21 }
   0xd   :  { %810 = vmatmul.msk.bf16.vlgmr.msra.gmra.mxu3 %vm84_vm1, %v82_v23  ;;  %v78_v35 = vpack.c.bf16 %v66_v31, %v65_v30  ;;  %v81_v41 = vpack.c.bf16 %v72_v40, %v71_v39  ;;  %v261_v47 = vsel %vm259_vm2, %v233_v46, 0  ;;  %v895_v48 = vld [vmem:[%s1318_s4] sm:$0xff]  ;;  %v212_v53 = vld [vmem:[%s1315_s1 + $0x18] sm:$0xff]  ;;  %v214_v58 = vld [vmem:[%s1315_s1 + $0x28] sm:$0xff] }
   0xe   :  { %v80_v36 = vpack.c.bf16 %v70_v33, %v69_v32  ;;  %v319_v44 = vpack.c.b16 %v317_v43, %v317_v43  ;;  %270 = vmatpush.bf16.msrb.mxu1 %v261_v47  ;;  %v209_v49 = vld [vmem:[%s1315_s1] sm:$0xff]  ;;  %v226_v54 = vpack.c.bf16 %v212_v53, %v211_v52  ;;  %v215_v3 = vld [vmem:[%s1315_s1 + $0x30] sm:$0xff]  ;;  %v216_v4 = vld [vmem:[%s1315_s1 + $0x38] sm:$0xff] }
   0xf   :  { %v225_v51 = vpack.c.bf16 %v210_v50, %v209_v49  ;;  %v1101_v56 = vld [vmem:[%s1317_s3] ss:$0 sm:$0xff]  ;;  %v228_v5 = vpack.c.bf16 %v216_v4, %v215_v3  ;;  %v218_v12 = vld [vmem:[%s1315_s1 + $0x48] sm:$0xff]  ;;  %v219_v20 = vld [vmem:[%s1315_s1 + $0x50] sm:$0xff] }
  0x10   :  { %v347_v45 = vsel %vm109_vm0, %v319_v44, 0  ;;  %v213_v57 = vld [vmem:[%s1315_s1 + $0x20] sm:$0xff]  ;;  %v220_v21 = vld [vmem:[%s1315_s1 + $0x58] sm:$0xff]  ;;  %v222_v29 = vld [vmem:[%s1315_s1 + $0x68] sm:$0xff] }
  0x11   :  { %355 = vmatpush.bf16.msrb.mxu2 %v347_v45  ;;  %v227_v59 = vpack.c.bf16 %v214_v58, %v213_v57  ;;  %v217_v11 = vld [vmem:[%s1315_s1 + $0x40] sm:$0xff]  ;;  %v230_v22 = vpack.c.bf16 %v220_v21, %v219_v20  ;;  %v903_v42 = vld [vmem:[%s1321_s7 + $0x38] sm:$0xff]  ;;  %v902_v43 = vld [vmem:[%s1321_s7 + $0x30] sm:$0xff] }
  0x12   :  { %v229_v13 = vpack.c.bf16 %v218_v12, %v217_v11  ;;  %v221_v28 = vld [vmem:[%s1315_s1 + $0x60] sm:$0xff]  ;;  %526 = vmatpush.bf16.msrb.mxu3 %v903_v42  ;;  %v901_v45 = vld [vmem:[%s1321_s7 + $0x28] sm:$0xff]  ;;  %v899_v53 = vld [vmem:[%s1321_s7 + $0x18] sm:$0xff] }
  0x13   :  { %v231_v30 = vpack.c.bf16 %v222_v29, %v221_v28  ;;  %v900_v50 = vld [vmem:[%s1321_s7 + $0x20] sm:$0xff]  ;;  %v897_v58 = vld [vmem:[%s1321_s7 + $0x8] sm:$0xff] }
  0x15   :  { %356 = vmatpush.bf16.msrb.mxu2 %v895_v48 }
  0x16   :  { %527 = vmatpush.bf16.msrb.mxu3 %v902_v43 }
  0x17   :  { %804 = vmatmul.msk.bf16.gmra.mxu0 %vm84_vm1, %v76_v34 }
  0x18   :  { %806 = vmatmul.msk.bf16.gmra.mxu1 %vm84_vm1, %v78_v35  ;;  %v223_v35 = vld [vmem:[%s1315_s1 + $0x70] sm:$0xff] }
  0x19   :  { %808 = vmatmul.msk.bf16.gmra.mxu2 %vm84_vm1, %v80_v36  ;;  %v224_v36 = vld [vmem:[%s1315_s1 + $0x78] sm:$0xff] }
  0x1a   :  { %v232_v37 = vpack.c.bf16 %v224_v36, %v223_v35  ;;  %528 = vmatpush.bf16.msrb.mxu3 %v901_v45 }
  0x1e   :  { %529 = vmatpush.bf16.msrb.mxu3 %v900_v50 }
  0x22   :  { %530 = vmatpush.bf16.msrb.mxu3 %v899_v53 }
  0x28   :  { %811 = vmatmul.msk.bf16.vlgmr.msrb.gmra.mxu1 %vm234_vm3, %v225_v51 }
  0x29   :  { %809 = vmatmul.msk.bf16.gmra.mxu2 %vm84_vm1, %v81_v41 }
  0x38   :  { %812 = vmatmul.msk.bf16.gmra.mxu1 %vm234_vm3, %v226_v54  ;;  %v898_v54 = vld [vmem:[%s1321_s7 + $0x10] sm:$0xff] }
  0x39   :  { %531 = vmatpush.bf16.msrb.mxu3 %v898_v54 }
  0x3d   :  { %532 = vmatpush.bf16.msrb.mxu3 %v897_v58 }
  0x48   :  { %813 = vmatmul.msk.bf16.gmra.mxu1 %vm234_vm3, %v227_v59 }
  0x58   :  { %814 = vmatmul.msk.bf16.gmra.mxu1 %vm234_vm3, %v228_v5 }
  0x68   :  { %815 = vmatmul.msk.bf16.gmra.mxu1 %vm234_vm3, %v229_v13 }
  0x78   :  { %816 = vmatmul.msk.bf16.gmra.mxu1 %vm234_vm3, %v230_v22 }
  0x84   :  { %v122_v55 = vpop.f32.mrf.mxu0 }
  0x85   :  { %vm166_vm4 = vcmp.eq.f32.partialorder %v122_v55, %v1101_v56  ;;  %v132_v2 = vpop.f32.mrf.mxu1 }
  0x86   :  { %v182_v62 = vsel %vm166_vm4, 1.0, %v947_v61  ;;  %vm170_vm9 = vcmp.eq.f32.partialorder %v132_v2, %v1101_v56 }
  0x87   :  { %v186_v14 = vsel %vm170_vm9, 1.0, %v947_v61 }
  0x88   :  { %817 = vmatmul.msk.bf16.gmra.mxu1 %vm234_vm3, %v231_v30 }
  0x8c   :  { %v124_v60 = vpop.f32.mrf.mxu0  ;;  %v142_v18 = vpop.f32.mrf.mxu2 }
  0x8d   :  { %vm167_vm5 = vcmp.eq.f32.partialorder %v124_v60, %v1101_v56  ;;  %v134_v10 = vpop.f32.mrf.mxu1  ;;  %vm174_vm13 = vcmp.eq.f32.partialorder %v142_v18, %v1101_v56 }
  0x8e   :  { %v183_v63 = vsel %vm167_vm5, 1.0, %v947_v61  ;;  %vm171_vm10 = vcmp.eq.f32.partialorder %v134_v10, %v1101_v56  ;;  %v190_v31 = vsel %vm174_vm13, 1.0, %v947_v61 }
  0x8f   :  { %v198_v0 = vpack.c.bf16 %v183_v63, %v182_v62  ;;  %v187_v15 = vsel %vm171_vm10, 1.0, %v947_v61 }
  0x90   :  { %v200_v17 = vpack.c.bf16 %v187_v15, %v186_v14  ;;  %v157_v48 = vpop.f32.mrf.mxu3 }
  0x91   :  { %823 = vmatmul.msk.bf16.vlgmr.msrb.gmra.mxu2 %vm321_vm6, %v198_v0 }
  0x94   :  { %v127_v1 = vpop.f32.mrf.mxu0  ;;  %v144_v25 = vpop.f32.mrf.mxu2 }
  0x95   :  { %vm168_vm7 = vcmp.eq.f32.partialorder %v127_v1, %v1101_v56  ;;  %v137_v16 = vpop.f32.mrf.mxu1  ;;  %vm175_vm14 = vcmp.eq.f32.partialorder %v144_v25, %v1101_v56 }
  0x96   :  { %v184_v7 = vsel %vm168_vm7, 1.0, %v947_v61  ;;  %vm172_vm11 = vcmp.eq.f32.partialorder %v137_v16, %v1101_v56  ;;  %v191_v32 = vsel %vm175_vm14, 1.0, %v947_v61 }
  0x97   :  { %v188_v23 = vsel %vm172_vm11, 1.0, %v947_v61  ;;  %v202_v33 = vpack.c.bf16 %v191_v32, %v190_v31 }
  0x98   :  { %818 = vmatmul.msk.bf16.gmra.mxu1 %vm234_vm3, %v232_v37  ;;  %v159_v51 = vpop.f32.mrf.mxu3  ;;  %vm180_vm3 = vcmp.eq.f32.partialorder %v157_v48, %v1101_v56 }
  0x99   :  { %vm181_vm4 = vcmp.eq.f32.partialorder %v159_v51, %v1101_v56  ;;  %v196_v55 = vsel %vm180_vm3, 1.0, %v947_v61 }
  0x9a   :  { %v197_v57 = vsel %vm181_vm4, 1.0, %v947_v61 }
  0x9b   :  { %v205_v59 = vpack.c.bf16 %v197_v57, %v196_v55 }
  0x9c   :  { %v129_v6 = vpop.f32.mrf.mxu0  ;;  %v147_v27 = vpop.f32.mrf.mxu2 }
  0x9d   :  { %vm169_vm8 = vcmp.eq.f32.partialorder %v129_v6, %v1101_v56  ;;  %v139_v19 = vpop.f32.mrf.mxu1  ;;  %vm176_vm15 = vcmp.eq.f32.partialorder %v147_v27, %v1101_v56 }
  0x9e   :  { %v185_v8 = vsel %vm169_vm8, 1.0, %v947_v61  ;;  %vm173_vm12 = vcmp.eq.f32.partialorder %v139_v19, %v1101_v56  ;;  %v192_v38 = vsel %vm176_vm15, 1.0, %v947_v61 }
  0x9f   :  { %v199_v9 = vpack.c.bf16 %v185_v8, %v184_v7  ;;  %v189_v24 = vsel %vm173_vm12, 1.0, %v947_v61 }
  0xa0   :  { %v201_v26 = vpack.c.bf16 %v189_v24, %v188_v23 }
  0xa1   :  { %824 = vmatmul.msk.bf16.gmra.mxu2 %vm321_vm6, %v199_v9 }
  0xa4   :  { %v149_v34 = vpop.f32.mrf.mxu2 }
  0xa5   :  { %vm177_vm0 = vcmp.eq.f32.partialorder %v149_v34, %v1101_v56  ;;  %v272_v52 = vpop.f32.mrf.mxu1 }
  0xa6   :  { %v193_v39 = vsel %vm177_vm0, 1.0, %v947_v61 }
  0xa7   :  { %v203_v41 = vpack.c.bf16 %v193_v39, %v192_v38 }
  0xac   :  { %v152_v40 = vpop.f32.mrf.mxu2 }
  0xad   :  { %vm178_vm1 = vcmp.eq.f32.partialorder %v152_v40, %v1101_v56  ;;  %v274_v60 = vpop.f32.mrf.mxu1 }
  0xae   :  { %v194_v46 = vsel %vm178_vm1, 1.0, %v947_v61 }
  0xb1   :  { %825 = vmatmul.msk.bf16.gmra.mxu2 %vm321_vm6, %v200_v17 }
  0xb4   :  { %v154_v44 = vpop.f32.mrf.mxu2 }
  0xb5   :  { %vm179_vm2 = vcmp.eq.f32.partialorder %v154_v44, %v1101_v56  ;;  %v896_v56 = vld [vmem:[%s1321_s7] sm:$0xff]  ;;  %v277_v62 = vpop.f32.mrf.mxu1 }
  0xb6   :  { %v195_v47 = vsel %vm179_vm2, 1.0, %v947_v61  ;;  %533 = vmatpush.bf16.msrb.mxu3 %v896_v56  ;;  %v1212_v61 = vld [vmem:[%s1320_s6] ss:$0 sm:$0xff] }
  0xb7   :  { %v204_v49 = vpack.c.bf16 %v195_v47, %v194_v46 }
  0xbd   :  { %v279_v0 = vpop.f32.mrf.mxu1 }
  0xc1   :  { %826 = vmatmul.msk.bf16.gmra.mxu2 %vm321_vm6, %v201_v26 }
  0xc5   :  { %v282_v5 = vpop.f32.mrf.mxu1 }
  0xcd   :  { %v284_v14 = vpop.f32.mrf.mxu1 }
  0xd1   :  { %827 = vmatmul.msk.bf16.gmra.mxu2 %vm321_vm6, %v202_v33 }
  0xd5   :  { %v287_v21 = vpop.f32.mrf.mxu1 }
  0xdd   :  { %v289_v29 = vpop.f32.mrf.mxu1 }
  0xe1   :  { %828 = vmatmul.msk.bf16.gmra.mxu2 %vm321_vm6, %v203_v41 }
  0xe5   :  { %v292_v38 = vpop.f32.mrf.mxu1 }
  0xed   :  { %v294_v45 = vpop.f32.mrf.mxu1 }
  0xf1   :  { %829 = vmatmul.msk.bf16.gmra.mxu2 %vm321_vm6, %v204_v49 }
 0x101   :  { %830 = vmatmul.msk.bf16.gmra.mxu2 %vm321_vm6, %v205_v59 }
 0x114   :  { %v358_v63 = vpop.f32.mrf.mxu2 }
 0x115   :  { %v359_v1 = vadd.f32 %v358_v63, %v272_v52  ;;  %v297_v52 = vpop.f32.mrf.mxu1 }
 0x117   :  { %v402_v2 = vadd.f32 %v1212_v61, %v359_v1 }
 0x119   :  { %v418_v6 = vmax.f32 %v402_v2, 0.0 }
 0x11b   :  { %v434_v9 = vadd.f32 %v418_v6, %v402_v2 }
 0x11c   :  { %v360_v3 = vpop.f32.mrf.mxu2 }
 0x11d   :  { %v361_v4 = vadd.f32 %v360_v3, %v274_v60 }
 0x11f   :  { %v403_v7 = vadd.f32 %v1212_v61, %v361_v4 }
 0x121   :  { %v419_v8 = vmax.f32 %v403_v7, 0.0 }
 0x123   :  { %v435_v10 = vadd.f32 %v419_v8, %v403_v7 }
 0x124   :  { %v363_v11 = vpop.f32.mrf.mxu2 }
 0x125   :  { %v450_v12 = vpack.c.bf16 %v435_v10, %v434_v9  ;;  %v364_v13 = vadd.f32 %v363_v11, %v277_v62  ;;  %v299_v62 = vpop.f32.mrf.mxu1 }
 0x127   :  { %534 = vmatmul.bf16.vlgmr.msrb.gmra.mxu3 %v450_v12  ;;  %v404_v15 = vadd.f32 %v1212_v61, %v364_v13 }
 0x129   :  { %v420_v18 = vmax.f32 %v404_v15, 0.0 }
 0x12b   :  { %v436_v22 = vadd.f32 %v420_v18, %v404_v15 }
 0x12c   :  { %v365_v16 = vpop.f32.mrf.mxu2 }
 0x12d   :  { %v366_v17 = vadd.f32 %v365_v16, %v279_v0  ;;  %v910_v16 = vld [vmem:[%s1323_s9 + $0x30] sm:$0xff] }
 0x12f   :  { %v405_v19 = vadd.f32 %v1212_v61, %v366_v17 }
 0x131   :  { %v421_v20 = vmax.f32 %v405_v19, 0.0 }
 0x133   :  { %v437_v23 = vadd.f32 %v421_v20, %v405_v19  ;;  %v909_v20 = vld [vmem:[%s1323_s9 + $0x28] sm:$0xff] }
 0x134   :  { %v368_v24 = vpop.f32.mrf.mxu2 }
 0x135   :  { %v451_v25 = vpack.c.bf16 %v437_v23, %v436_v22  ;;  %v369_v26 = vadd.f32 %v368_v24, %v282_v5  ;;  %v302_v5 = vpop.f32.mrf.mxu1  ;;  %v908_v24 = vld [vmem:[%s1323_s9 + $0x20] sm:$0xff] }
 0x137   :  { %539 = vmatmul.bf16.gmra.mxu3 %v451_v25  ;;  %v406_v27 = vadd.f32 %v1212_v61, %v369_v26 }
 0x139   :  { %v422_v31 = vmax.f32 %v406_v27, 0.0 }
 0x13b   :  { %v438_v34 = vadd.f32 %v422_v31, %v406_v27  ;;  %v907_v31 = vld [vmem:[%s1323_s9 + $0x18] sm:$0xff] }
 0x13c   :  { %v370_v28 = vpop.f32.mrf.mxu2 }
 0x13d   :  { %v371_v30 = vadd.f32 %v370_v28, %v284_v14  ;;  %v911_v14 = vld [vmem:[%s1323_s9 + $0x38] sm:$0xff]  ;;  %v304_v15 = vpop.f32.mrf.mxu1 }
 0x13e   :  { %683 = vmatpush.bf16.msrb.mxu0 %v911_v14 }
 0x13f   :  { %v407_v32 = vadd.f32 %v1212_v61, %v371_v30 }
 0x141   :  { %v423_v33 = vmax.f32 %v407_v32, 0.0 }
 0x142   :  { %684 = vmatpush.bf16.msrb.mxu0 %v910_v16 }
 0x143   :  { %v439_v35 = vadd.f32 %v423_v33, %v407_v32 }
 0x144   :  { %v373_v36 = vpop.f32.mrf.mxu2 }
 0x145   :  { %v452_v37 = vpack.c.bf16 %v439_v35, %v438_v34  ;;  %v374_v39 = vadd.f32 %v373_v36, %v287_v21  ;;  %v307_v25 = vpop.f32.mrf.mxu1  ;;  %v906_v36 = vld [vmem:[%s1323_s9 + $0x10] sm:$0xff] }
 0x146   :  { %685 = vmatpush.bf16.msrb.mxu0 %v909_v20 }
 0x147   :  { %544 = vmatmul.bf16.gmra.mxu3 %v452_v37  ;;  %v408_v40 = vadd.f32 %v1212_v61, %v374_v39 }
 0x149   :  { %v424_v43 = vmax.f32 %v408_v40, 0.0 }
 0x14a   :  { %686 = vmatpush.bf16.msrb.mxu0 %v908_v24 }
 0x14b   :  { %v440_v47 = vadd.f32 %v424_v43, %v408_v40  ;;  %v905_v40 = vld [vmem:[%s1323_s9 + $0x8] sm:$0xff] }
 0x14c   :  { %v375_v41 = vpop.f32.mrf.mxu2 }
 0x14d   :  { %v376_v42 = vadd.f32 %v375_v41, %v289_v29  ;;  %v309_v33 = vpop.f32.mrf.mxu1 }
 0x14e   :  { %687 = vmatpush.bf16.msrb.mxu0 %v907_v31 }
 0x14f   :  { %v409_v44 = vadd.f32 %v1212_v61, %v376_v42 }
 0x151   :  { %v425_v46 = vmax.f32 %v409_v44, 0.0 }
 0x152   :  { %688 = vmatpush.bf16.msrb.mxu0 %v906_v36 }
 0x153   :  { %v441_v48 = vadd.f32 %v425_v46, %v409_v44  ;;  %v904_v44 = vld [vmem:[%s1323_s9] sm:$0xff] }
 0x154   :  { %v378_v49 = vpop.f32.mrf.mxu2 }
 0x155   :  { %v453_v50 = vpack.c.bf16 %v441_v48, %v440_v47  ;;  %v379_v51 = vadd.f32 %v378_v49, %v292_v38 }
 0x156   :  { %689 = vmatpush.bf16.msrb.mxu0 %v905_v40 }
 0x157   :  { %549 = vmatmul.bf16.gmra.mxu3 %v453_v50  ;;  %v410_v53 = vadd.f32 %v1212_v61, %v379_v51 }
 0x159   :  { %v426_v57 = vmax.f32 %v410_v53, 0.0 }
 0x15a   :  { %690 = vmatpush.bf16.msrb.mxu0 %v904_v44 }
 0x15b   :  { %v442_v60 = vadd.f32 %v426_v57, %v410_v53 }
 0x15c   :  { %v380_v54 = vpop.f32.mrf.mxu2 }
 0x15d   :  { %v381_v55 = vadd.f32 %v380_v54, %v294_v45 }
 0x15f   :  { %v411_v58 = vadd.f32 %v1212_v61, %v381_v55 }
 0x161   :  { %v427_v59 = vmax.f32 %v411_v58, 0.0 }
 0x163   :  { %v443_v56 = vadd.f32 %v427_v59, %v411_v58 }
 0x164   :  { %v383_v63 = vpop.f32.mrf.mxu2 }
 0x165   :  { %v454_v0 = vpack.c.bf16 %v443_v56, %v442_v60  ;;  %v384_v1 = vadd.f32 %v383_v63, %v297_v52 }
 0x167   :  { %554 = vmatmul.bf16.gmra.mxu3 %v454_v0  ;;  %v412_v2 = vadd.f32 %v1212_v61, %v384_v1 }
 0x169   :  { %v428_v6 = vmax.f32 %v412_v2, 0.0 }
 0x16b   :  { %v444_v9 = vadd.f32 %v428_v6, %v412_v2 }
 0x16c   :  { %v385_v3 = vpop.f32.mrf.mxu2 }
 0x16d   :  { %v386_v4 = vadd.f32 %v385_v3, %v299_v62 }
 0x16f   :  { %v413_v7 = vadd.f32 %v1212_v61, %v386_v4 }
 0x171   :  { %v429_v8 = vmax.f32 %v413_v7, 0.0 }
 0x173   :  { %v445_v10 = vadd.f32 %v429_v8, %v413_v7 }
 0x174   :  { %v388_v11 = vpop.f32.mrf.mxu2 }
 0x175   :  { %v455_v12 = vpack.c.bf16 %v445_v10, %v444_v9  ;;  %v389_v13 = vadd.f32 %v388_v11, %v302_v5 }
 0x177   :  { %559 = vmatmul.bf16.gmra.mxu3 %v455_v12  ;;  %v414_v17 = vadd.f32 %v1212_v61, %v389_v13 }
 0x179   :  { %v430_v21 = vmax.f32 %v414_v17, 0.0 }
 0x17b   :  { %v446_v26 = vadd.f32 %v430_v21, %v414_v17 }
 0x17c   :  { %v390_v18 = vpop.f32.mrf.mxu2 }
 0x17d   :  { %v391_v19 = vadd.f32 %v390_v18, %v304_v15 }
 0x17f   :  { %v415_v22 = vadd.f32 %v1212_v61, %v391_v19 }
 0x181   :  { %v431_v23 = vmax.f32 %v415_v22, 0.0 }
 0x183   :  { %v447_v27 = vadd.f32 %v431_v23, %v415_v22 }
 0x184   :  { %v393_v28 = vpop.f32.mrf.mxu2 }
 0x185   :  { %v456_v29 = vpack.c.bf16 %v447_v27, %v446_v26  ;;  %v394_v30 = vadd.f32 %v393_v28, %v307_v25 }
 0x187   :  { %564 = vmatmul.bf16.gmra.mxu3 %v456_v29  ;;  %v416_v32 = vadd.f32 %v1212_v61, %v394_v30 }
 0x189   :  { %v432_v37 = vmax.f32 %v416_v32, 0.0 }
 0x18b   :  { %v448_v41 = vadd.f32 %v432_v37, %v416_v32 }
 0x18c   :  { %v395_v34 = vpop.f32.mrf.mxu2 }
 0x18d   :  { %v396_v35 = vadd.f32 %v395_v34, %v309_v33 }
 0x18f   :  { %v417_v38 = vadd.f32 %v1212_v61, %v396_v35  ;;  %v1257_v61 = vld [vmem:[%s1322_s8] ss:$0 sm:$0xff] }
 0x191   :  { %v433_v39 = vmax.f32 %v417_v38, 0.0 }
 0x193   :  { %v449_v42 = vadd.f32 %v433_v39, %v417_v38 }
 0x195   :  { %v457_v43 = vpack.c.bf16 %v449_v42, %v448_v41 }
 0x197   :  { %569 = vmatmul.bf16.gmra.mxu3 %v457_v43 }
 0x1aa   :  { %v535_v45 = vpop.f32.mrf.mxu3 }
 0x1ab   :  { %v536_v46 = vadd.f32 %v1257_v61, %v535_v45 }
 0x1ad   :  { %v575_v48 = vmax.f32 %v536_v46, 0.0 }
 0x1af   :  { %v591_v51 = vadd.f32 %v575_v48, %v536_v46 }
 0x1b2   :  { %v537_v47 = vpop.f32.mrf.mxu3 }
 0x1b3   :  { %v538_v49 = vadd.f32 %v1257_v61, %v537_v47 }
 0x1b5   :  { %v576_v50 = vmax.f32 %v538_v49, 0.0 }
 0x1b7   :  { %v592_v52 = vadd.f32 %v576_v50, %v538_v49 }
 0x1b9   :  { %v607_v53 = vpack.c.bf16 %v592_v52, %v591_v51 }
 0x1ba   :  { %v540_v54 = vpop.f32.mrf.mxu3 }
 0x1bb   :  { %691 = vmatmul.bf16.vlgmr.msrb.gmra.mxu0 %v607_v53  ;;  %v541_v55 = vadd.f32 %v1257_v61, %v540_v54 }
 0x1bd   :  { %v577_v58 = vmax.f32 %v541_v55, 0.0 }
 0x1bf   :  { %v593_v56 = vadd.f32 %v577_v58, %v541_v55  ;;  %v1278_v55 = vld [vmem:[%s1324_s10] ss:$0 sm:$0xff] }
 0x1c2   :  { %v542_v57 = vpop.f32.mrf.mxu3 }
 0x1c3   :  { %v543_v59 = vadd.f32 %v1257_v61, %v542_v57 }
 0x1c5   :  { %v578_v60 = vmax.f32 %v543_v59, 0.0 }
 0x1c7   :  { %v594_v62 = vadd.f32 %v578_v60, %v543_v59 }
 0x1c9   :  { %v608_v63 = vpack.c.bf16 %v594_v62, %v593_v56 }
 0x1ca   :  { %v545_v0 = vpop.f32.mrf.mxu3 }
 0x1cb   :  { %696 = vmatmul.bf16.gmra.mxu0 %v608_v63  ;;  %v546_v1 = vadd.f32 %v1257_v61, %v545_v0 }
 0x1cd   :  { %v579_v3 = vmax.f32 %v546_v1, 0.0 }
 0x1cf   :  { %v595_v6 = vadd.f32 %v579_v3, %v546_v1 }
 0x1d2   :  { %v547_v2 = vpop.f32.mrf.mxu3 }
 0x1d3   :  { %v548_v4 = vadd.f32 %v1257_v61, %v547_v2 }
 0x1d5   :  { %v580_v5 = vmax.f32 %v548_v4, 0.0 }
 0x1d7   :  { %v596_v7 = vadd.f32 %v580_v5, %v548_v4 }
 0x1d9   :  { %v609_v8 = vpack.c.bf16 %v596_v7, %v595_v6 }
 0x1da   :  { %v550_v9 = vpop.f32.mrf.mxu3 }
 0x1db   :  { %701 = vmatmul.bf16.gmra.mxu0 %v609_v8  ;;  %v551_v10 = vadd.f32 %v1257_v61, %v550_v9 }
 0x1dd   :  { %v581_v12 = vmax.f32 %v551_v10, 0.0 }
 0x1df   :  { %v597_v15 = vadd.f32 %v581_v12, %v551_v10 }
 0x1e2   :  { %v552_v11 = vpop.f32.mrf.mxu3 }
 0x1e3   :  { %v553_v13 = vadd.f32 %v1257_v61, %v552_v11 }
 0x1e5   :  { %v582_v14 = vmax.f32 %v553_v13, 0.0 }
 0x1e7   :  { %v598_v16 = vadd.f32 %v582_v14, %v553_v13 }
 0x1e9   :  { %v610_v17 = vpack.c.bf16 %v598_v16, %v597_v15 }
 0x1ea   :  { %v555_v18 = vpop.f32.mrf.mxu3 }
 0x1eb   :  { %706 = vmatmul.bf16.gmra.mxu0 %v610_v17  ;;  %v556_v19 = vadd.f32 %v1257_v61, %v555_v18 }
 0x1ed   :  { %v583_v21 = vmax.f32 %v556_v19, 0.0 }
 0x1ef   :  { %v599_v24 = vadd.f32 %v583_v21, %v556_v19 }
 0x1f2   :  { %v557_v20 = vpop.f32.mrf.mxu3 }
 0x1f3   :  { %v558_v22 = vadd.f32 %v1257_v61, %v557_v20 }
 0x1f5   :  { %v584_v23 = vmax.f32 %v558_v22, 0.0 }
 0x1f7   :  { %v600_v25 = vadd.f32 %v584_v23, %v558_v22 }
 0x1f9   :  { %v611_v26 = vpack.c.bf16 %v600_v25, %v599_v24 }
 0x1fa   :  { %v560_v27 = vpop.f32.mrf.mxu3 }
 0x1fb   :  { %711 = vmatmul.bf16.gmra.mxu0 %v611_v26  ;;  %v561_v28 = vadd.f32 %v1257_v61, %v560_v27 }
 0x1fd   :  { %v585_v30 = vmax.f32 %v561_v28, 0.0 }
 0x1ff   :  { %v601_v33 = vadd.f32 %v585_v30, %v561_v28 }
 0x202   :  { %v562_v29 = vpop.f32.mrf.mxu3 }
 0x203   :  { %v563_v31 = vadd.f32 %v1257_v61, %v562_v29 }
 0x205   :  { %v586_v32 = vmax.f32 %v563_v31, 0.0 }
 0x207   :  { %v602_v34 = vadd.f32 %v586_v32, %v563_v31 }
 0x209   :  { %v612_v35 = vpack.c.bf16 %v602_v34, %v601_v33 }
 0x20a   :  { %v565_v36 = vpop.f32.mrf.mxu3 }
 0x20b   :  { %716 = vmatmul.bf16.gmra.mxu0 %v612_v35  ;;  %v566_v37 = vadd.f32 %v1257_v61, %v565_v36 }
 0x20d   :  { %v587_v39 = vmax.f32 %v566_v37, 0.0 }
 0x20f   :  { %v603_v42 = vadd.f32 %v587_v39, %v566_v37 }
 0x212   :  { %v567_v38 = vpop.f32.mrf.mxu3 }
 0x213   :  { %v568_v40 = vadd.f32 %v1257_v61, %v567_v38 }
 0x215   :  { %v588_v41 = vmax.f32 %v568_v40, 0.0 }
 0x217   :  { %v604_v43 = vadd.f32 %v588_v41, %v568_v40 }
 0x219   :  { %v613_v44 = vpack.c.bf16 %v604_v43, %v603_v42 }
 0x21a   :  { %v570_v45 = vpop.f32.mrf.mxu3 }
 0x21b   :  { %721 = vmatmul.bf16.gmra.mxu0 %v613_v44  ;;  %v571_v46 = vadd.f32 %v1257_v61, %v570_v45 }
 0x21d   :  { %v589_v48 = vmax.f32 %v571_v46, 0.0 }
 0x21f   :  { %v605_v51 = vadd.f32 %v589_v48, %v571_v46 }
 0x222   :  { %v572_v47 = vpop.f32.mrf.mxu3 }
 0x223   :  { %v573_v49 = vadd.f32 %v1257_v61, %v572_v47 }
 0x225   :  { %v590_v50 = vmax.f32 %v573_v49, 0.0 }
 0x227   :  { %v606_v52 = vadd.f32 %v590_v50, %v573_v49 }
 0x229   :  { %v614_v53 = vpack.c.bf16 %v606_v52, %v605_v51 }
 0x22b   :  { %726 = vmatmul.bf16.gmra.mxu0 %v614_v53 }
 0x238   :  { %v692_v54 = vpop.f32.mrf.mxu0 }
 0x239   :  { %v693_v57 = vadd.f32 %v1278_v55, %v692_v54 }
 0x23b   :  { %v732_v59 = vmax.f32 %v693_v57, 0.0 }
 0x23d   :  { %v1282_v62 = vadd.f32 %v732_v59, %v693_v57 }
 0x240   :  { %v694_v58 = vpop.f32.mrf.mxu0 }
 0x241   :  { %v695_v60 = vadd.f32 %v1278_v55, %v694_v58 }
 0x243   :  { %v733_v56 = vmax.f32 %v695_v60, 0.0 }
 0x245   :  { %v1284_v61 = vadd.f32 %v733_v56, %v695_v60 }
 0x247   :  { %v765_v63 = vpack.c.bf16 %v1284_v61, %v1282_v62 }
 0x248   :  { %v697_v0 = vpop.f32.mrf.mxu0 }
 0x249   :  { %v698_v1 = vadd.f32 %v1278_v55, %v697_v0 }
 0x24b   :  { %v734_v3 = vmax.f32 %v698_v1, 0.0 }
 0x24d   :  { %v1290_v6 = vadd.f32 %v734_v3, %v698_v1 }
 0x250   :  { %v699_v2 = vpop.f32.mrf.mxu0 }
 0x251   :  { %v700_v4 = vadd.f32 %v1278_v55, %v699_v2 }
 0x253   :  { %v735_v5 = vmax.f32 %v700_v4, 0.0 }
 0x255   :  { %v751_v7 = vadd.f32 %v735_v5, %v700_v4 }
 0x257   :  { %v766_v8 = vpack.c.bf16 %v751_v7, %v1290_v6 }
 0x258   :  { %v702_v9 = vpop.f32.mrf.mxu0 }
 0x259   :  { %v703_v10 = vadd.f32 %v1278_v55, %v702_v9 }
 0x25b   :  { %v736_v12 = vmax.f32 %v703_v10, 0.0 }
 0x25d   :  { %v752_v15 = vadd.f32 %v736_v12, %v703_v10 }
 0x260   :  { %v704_v11 = vpop.f32.mrf.mxu0 }
 0x261   :  { %v705_v13 = vadd.f32 %v1278_v55, %v704_v11 }
 0x263   :  { %v737_v14 = vmax.f32 %v705_v13, 0.0 }
 0x265   :  { %v753_v16 = vadd.f32 %v737_v14, %v705_v13 }
 0x267   :  { %v767_v17 = vpack.c.bf16 %v753_v16, %v752_v15 }
 0x268   :  { %v707_v18 = vpop.f32.mrf.mxu0 }
 0x269   :  { %v708_v19 = vadd.f32 %v1278_v55, %v707_v18 }
 0x26b   :  { %v738_v21 = vmax.f32 %v708_v19, 0.0 }
 0x26d   :  { %v754_v24 = vadd.f32 %v738_v21, %v708_v19 }
 0x270   :  { %v709_v20 = vpop.f32.mrf.mxu0 }
 0x271   :  { %v710_v22 = vadd.f32 %v1278_v55, %v709_v20 }
 0x273   :  { %v739_v23 = vmax.f32 %v710_v22, 0.0 }
 0x275   :  { %v755_v25 = vadd.f32 %v739_v23, %v710_v22 }
 0x277   :  { %v768_v26 = vpack.c.bf16 %v755_v25, %v754_v24 }
 0x278   :  { %v712_v27 = vpop.f32.mrf.mxu0 }
 0x279   :  { %v713_v28 = vadd.f32 %v1278_v55, %v712_v27 }
 0x27b   :  { %v740_v30 = vmax.f32 %v713_v28, 0.0 }
 0x27d   :  { %v756_v33 = vadd.f32 %v740_v30, %v713_v28 }
 0x280   :  { %v714_v29 = vpop.f32.mrf.mxu0 }
 0x281   :  { %v715_v31 = vadd.f32 %v1278_v55, %v714_v29 }
 0x283   :  { %v741_v32 = vmax.f32 %v715_v31, 0.0 }
 0x285   :  { %v757_v34 = vadd.f32 %v741_v32, %v715_v31 }
 0x287   :  { %v769_v35 = vpack.c.bf16 %v757_v34, %v756_v33 }
 0x288   :  { %v717_v36 = vpop.f32.mrf.mxu0 }
 0x289   :  { %v718_v57 = vadd.f32 %v1278_v55, %v717_v36 }
 0x28b   :  { %v742_v56 = vmax.f32 %v718_v57, 0.0 }
 0x28d   :  { %v758_v1 = vadd.f32 %v742_v56, %v718_v57 }
 0x290   :  { %v719_v37 = vpop.f32.mrf.mxu0 }
 0x291   :  { %v720_v53 = vadd.f32 %v1278_v55, %v719_v37 }
 0x293   :  { %v743_v59 = vmax.f32 %v720_v53, 0.0 }
 0x295   :  { %v759_v0 = vadd.f32 %v743_v59, %v720_v53 }
 0x297   :  { %v770_v2 = vpack.c.bf16 %v759_v0, %v758_v1 }
 0x298   :  { %v722_v38 = vpop.f32.mrf.mxu0 }
 0x299   :  { %v723_v47 = vadd.f32 %v1278_v55, %v722_v38 }
 0x29b   :  { %v744_v52 = vmax.f32 %v723_v47, 0.0 }
 0x29d   :  { %v760_v58 = vadd.f32 %v744_v52, %v723_v47 }
 0x2a0   :  { %v724_v39 = vpop.f32.mrf.mxu0 }
 0x2a1   :  { %v725_v45 = vadd.f32 %v1278_v55, %v724_v39 }
 0x2a3   :  { %v745_v50 = vmax.f32 %v725_v45, 0.0 }
 0x2a5   :  { %v761_v54 = vadd.f32 %v745_v50, %v725_v45 }
 0x2a7   :  { %v771_v60 = vpack.c.bf16 %v761_v54, %v760_v58 }
 0x2a8   :  { %v727_v40 = vpop.f32.mrf.mxu0 }
 0x2a9   :  { %v728_v41 = vadd.f32 %v1278_v55, %v727_v40 }
 0x2ab   :  { %v746_v43 = vmax.f32 %v728_v41, 0.0 }
 0x2ad   :  { %v762_v48 = vadd.f32 %v746_v43, %v728_v41 }
 0x2b0   :  { %v729_v42 = vpop.f32.mrf.mxu0 }
 0x2b1   :  { %v730_v44 = vadd.f32 %v1278_v55, %v729_v42  ;;  %v764_v55 = vld [vmem:[%s1325_s11] sm:$0x1] }
 0x2b3   :  { %v747_v46 = vmax.f32 %v730_v44, 0.0 }
 0x2b5   :  { %v763_v49 = vadd.f32 %v747_v46, %v730_v44 }
 0x2b7   :  { %v772_v51 = vpack.c.bf16 %v763_v49, %v762_v48 }
 0x2b9   :  { %773 = vmatpush.bf16.xpose.msra.mxu1 %v772_v51 }
 0x2c1   :  { %774 = vmatpush.bf16.xpose.msra.mxu1 %v771_v60 }
 0x2c9   :  { %775 = vmatpush.bf16.xpose.msra.mxu1 %v770_v2 }
 0x2d1   :  { %776 = vmatpush.bf16.xpose.msra.mxu1 %v769_v35 }
 0x2d9   :  { %777 = vmatpush.bf16.xpose.msra.mxu1 %v768_v26 }
 0x2e1   :  { %778 = vmatpush.bf16.xpose.msra.mxu1 %v767_v17 }
 0x2e9   :  { %779 = vmatpush.bf16.xpose.msra.mxu1 %v766_v8 }
 0x2f1   :  { %780 = vmatpush.bf16.xpose.msra.mxu1 %v765_v63 }
 0x2f8   :  { %781 = vmatmul.bf16.vlgmr.msra.gmra.mxu1 %v764_v55 }
 0x375   :  { %v782_v3 = vpop.f32.mrf.mxu1 }
 0x376   :  { %786 = vst [vmem:[#allocation2] sm:$0x1] %v782_v3 }
 0x377   :  { %797 = dma.vmem_to_hbm [thread:$0]  %s793_s21, 16, %s795_s24, [#allocation3]  }
 0x37d   :  { %v784_v4 = vpop.f32.mrf.mxu1 }
 0x37e   :  { %945 = dma.done.wait [#allocation3], 16  }
 0x37f   :  { %946 = vsyncadd [#allocation3], 4294967280 }
 0x380   :  { %802 = vsyncpa [#allocation3], 1 }

</bundles_post_ra>
